<compile_context>
chip_gen: v7x
topology: tpu7x:2x2x1
jax: 0.10.0
libtpu: 0.0.40
codegen_flags: <defaults>
</compile_context>

<pallas_src>
import functools
import math

import jax
import jax.numpy as jnp
from jax.experimental import pallas as pl
from jax.experimental.pallas import tpu as pltpu


# ----------------------------------------------------------------------------
# Kernels
# ----------------------------------------------------------------------------
def _layernorm_kernel(x_ref, scale_ref, shift_ref, o_ref, *, eps):
    """Standard path (emb >= 128): reduce over the lane axis per row.

    NOTE: every statement is per-row, so garbage rows in a ragged
    (Mosaic-masked) last block cannot contaminate valid rows.
    """
    x = x_ref[...].astype(jnp.float32)
    mean = jnp.mean(x, axis=-1, keepdims=True)
    xc = x - mean                                     # centered value, reused
    var = jnp.mean(xc * xc, axis=-1, keepdims=True)   # population variance
    inv = jax.lax.rsqrt(var + eps)
    scale = scale_ref[...].astype(jnp.float32)
    shift = shift_ref[...].astype(jnp.float32)
    # TODO(synk): on v7x with bf16 I/O, the final normalize could run in bf16
    # (f32 stats kept) if a bundle dump shows VALU as the saturating slot.
    o_ref[...] = (xc * inv * scale + shift).astype(o_ref.dtype)


def _layernorm_folded_kernel(x_ref, scale_ref, shift_ref, seg_ref, o_ref, *,
                             eps, inv_n):
    """Lane-folded path (emb < 128): k rows packed along the 128-lane axis.

    seg_ref is a (F, F) block-diagonal 0/1 matrix (bf16); x @ seg broadcasts
    each segment's sum back across its own lanes.  The operand is split into
    bf16 hi/lo parts so the MXU (exact bf16 products, f32 accumulate) yields
    an f32-accurate segmented sum.  The matmul only mixes lanes, never rows,
    so garbage rows in a ragged last block stay confined to themselves.
    """
    x = x_ref[...].astype(jnp.float32)                # (rt, F), lane-dense
    m01 = seg_ref[...]                                # (F, F) bf16 {0, 1}

    def seg_sum(v):                                   # exact-ish segmented sum
        hi = v.astype(jnp.bfloat16)
        lo = (v - hi.astype(jnp.float32)).astype(jnp.bfloat16)
        return (jnp.dot(hi, m01, preferred_element_type=jnp.float32) +
                jnp.dot(lo, m01, preferred_element_type=jnp.float32))

    mean = seg_sum(x) * inv_n                         # per-segment mean
    xc = x - mean
    var = seg_sum(xc * xc) * inv_n                    # population variance
    inv = jax.lax.rsqrt(var + eps)
    scale = scale_ref[...].astype(jnp.float32)        # (1, F), pre-tiled
    shift = shift_ref[...].astype(jnp.float32)
    o_ref[...] = (xc * inv * scale + shift).astype(o_ref.dtype)


# ----------------------------------------------------------------------------
# Sizing helpers
# ----------------------------------------------------------------------------
def _tpu_memory_profile():
    """(vmem_capacity_bytes, target_block_bytes) for the local TPU generation."""
    kind = ""
    try:
        kind = jax.devices()[0].device_kind.lower()
    except Exception:
        pass
    vmem_cap = None
    try:
        vmem_cap = int(pltpu.get_tpu_info().vmem_capacity_bytes)
    except Exception:
        vmem_cap = None
    if not vmem_cap:
        # v7x has 64 MiB/TC; v5e/v6e have 128 MiB.
        vmem_cap = (64 << 20) if "7" in kind else (128 << 20)
    # v5e (~0.8 TB/s): 4 MiB already makes the ~0.35 us/step overhead <4%;
    # v6e/v7x (1.3-3.2 TB/s): use ~8 MiB per DMA'd block.
    target_block_bytes = (4 << 20) if "v5" in kind else (8 << 20)
    return vmem_cap, target_block_bytes


def _pick_row_tile(rows, lanes, itemsize, *, target_block_bytes,
                   vmem_limit_bytes, sublane_min, max_row_tile=32768):
    """Row tile: big enough to amortize per-step overhead (sized by bytes
    actually transferred), bounded so the whole resident working set —
    2x(in)+2x(out) double buffers in the I/O dtype plus ~3 f32 vector
    temporaries — fits under the VMEM limit with slack for Mosaic scratch."""
    rt_dma = max(1, target_block_bytes // (lanes * itemsize))
    per_row_bytes = lanes * (4 * itemsize + 3 * 4)
    rt_vmem = max(1, int(vmem_limit_bytes * 0.85) // per_row_bytes)
    rt = min(rt_dma, rt_vmem, max_row_tile)
    rt = max(sublane_min, (rt // sublane_min) * sublane_min)
    if rt >= rows:
        return rows            # single block, exactly matching the array
    return rt                  # ragged last block masked by Mosaic


# ----------------------------------------------------------------------------
# Wrapper
# ----------------------------------------------------------------------------
def layernorm(x, scale, shift, *, eps=1e-5, row_tile=None,
              vmem_limit_bytes=None):
    """LayerNorm over the last axis of x (matches torch LayerNorm semantics:
    population variance, eps inside the sqrt). x: (..., emb_dim)."""
    orig_shape = x.shape
    emb = orig_shape[-1]
    rows = math.prod(orig_shape[:-1]) if len(orig_shape) > 1 else 1

    vmem_cap, target_block_bytes = _tpu_memory_profile()
    if vmem_limit_bytes is None:
        vmem_limit_bytes = (vmem_cap * 3) // 4   # leave 25% for Mosaic internals

    x2d = x.reshape(rows, emb)

    # --- lane folding for small emb -----------------------------------------
    fold = 1
    if emb < 128 and (128 % emb == 0):
        k = 128 // emb
        if rows % k == 0:
            fold = k
    # TODO(synk): emb < 128 with 128 % emb != 0 (or rows % k != 0) still takes
    # the lane-sparse standard path; a padded/general fold could cover it.

    if fold > 1:
        lanes = fold * emb
        rows_k = rows // fold
        x2d = x2d.reshape(rows_k, lanes)
        scale_l = jnp.tile(scale.reshape(-1), (fold,)).reshape(1, lanes)
        shift_l = jnp.tile(shift.reshape(-1), (fold,)).reshape(1, lanes)
        seg = jnp.arange(lanes, dtype=jnp.int32) // emb
        seg_mat = (seg[:, None] == seg[None, :]).astype(jnp.bfloat16)
        kernel = functools.partial(_layernorm_folded_kernel, eps=eps,
                                   inv_n=1.0 / emb)
        extra_inputs = (seg_mat,)
        extra_specs = [pl.BlockSpec((lanes, lanes), lambda i: (0, 0))]
    else:
        lanes = emb
        rows_k = rows
        scale_l = scale.reshape(1, emb)
        shift_l = shift.reshape(1, emb)
        kernel = functools.partial(_layernorm_kernel, eps=eps)
        extra_inputs = ()
        extra_specs = []

    itemsize = x.dtype.itemsize
    sublane_min = {4: 8, 2: 16, 1: 32}.get(itemsize, 8)

    # Pad only genuinely tiny inputs (rows below the dtype sublane minimum);
    # everything else relies on Mosaic masking of the ragged last block.
    pad = sublane_min - rows_k if rows_k < sublane_min else 0
    if pad:
        x2d = jnp.pad(x2d, ((0, pad), (0, 0)))
    rows_p = rows_k + pad

    if row_tile is None:
        row_tile = _pick_row_tile(rows_p, lanes, itemsize,
                                  target_block_bytes=target_block_bytes,
                                  vmem_limit_bytes=vmem_limit_bytes,
                                  sublane_min=sublane_min)

    grid = (pl.cdiv(rows_p, row_tile),)
    out = pl.pallas_call(
        kernel,
        out_shape=jax.ShapeDtypeStruct((rows_p, lanes), x.dtype),
        grid_spec=pltpu.PrefetchScalarGridSpec(
            num_scalar_prefetch=0,
            grid=grid,
            in_specs=[
                pl.BlockSpec((row_tile, lanes), lambda i: (i, 0)),
                pl.BlockSpec((1, lanes), lambda i: (0, 0)),
                pl.BlockSpec((1, lanes), lambda i: (0, 0)),
                *extra_specs,
            ],
            out_specs=pl.BlockSpec((row_tile, lanes), lambda i: (i, 0)),
        ),
        compiler_params=pltpu.CompilerParams(
            # TODO(synk): on v7x, confirm via trace that this axis shards across
            # both TensorCores; otherwise switch to an explicit core axis.
            dimension_semantics=("parallel",),
            vmem_limit_bytes=int(vmem_limit_bytes),
        ),
    )(x2d, scale_l, shift_l, *extra_inputs)

    if pad:
        out = out[:rows_k]
    return out.reshape(orig_shape)


# ----------------------------------------------------------------------------
# Demo / self-check
# ----------------------------------------------------------------------------
if __name__ == "__main__":
    def ref_layernorm(x, scale, shift, eps=1e-5):
        mean = jnp.mean(x, axis=-1, keepdims=True)
        var = jnp.mean((x - mean) ** 2, axis=-1, keepdims=True)
        return scale * ((x - mean) / jnp.sqrt(var + eps)) + shift

    key = jax.random.PRNGKey(0)
    k1, k2 = jax.random.split(key)

    # Case 1: the module's demo shape (emb=32 < 128 -> lane-folded kernel),
    # params matching nn.Parameter(torch.ones/zeros(emb_dim)).
    batch, seq, emb_dim = 2, 8, 32
    x = jax.random.normal(k1, (batch, seq, emb_dim), dtype=jnp.float32)
    scale = jnp.ones((emb_dim,), dtype=jnp.float32)
    shift = jnp.zeros((emb_dim,), dtype=jnp.float32)
    out = jax.block_until_ready(layernorm(x, scale, shift))
    ref = ref_layernorm(x, scale, shift)
    assert out.shape == x.shape
    assert jnp.allclose(out, ref, atol=1e-5, rtol=1e-5), \
        float(jnp.max(jnp.abs(out - ref)))

    # Case 2: lane-dense emb >= 128 -> standard streaming kernel, with
    # non-trivial affine params.
    emb2 = 256
    x2 = jax.random.normal(k2, (4, 16, emb2), dtype=jnp.float32)
    scale2 = jax.random.normal(jax.random.PRNGKey(1), (emb2,), dtype=jnp.float32)
    shift2 = jax.random.normal(jax.random.PRNGKey(2), (emb2,), dtype=jnp.float32)
    out2 = jax.block_until_ready(layernorm(x2, scale2, shift2))
    ref2 = ref_layernorm(x2, scale2, shift2)
    assert out2.shape == x2.shape
    assert jnp.allclose(out2, ref2, atol=1e-5, rtol=1e-5), \
        float(jnp.max(jnp.abs(out2 - ref2)))

    print("KERNEL_OK")
</pallas_src>

<mosaic_0001>
module attributes {stable_mosaic.version = 11 : i64} {
  func.func @_layernorm_folded_kernel(%arg0: i32, %arg1: memref<8x128xf32, #tpu.memory_space<vmem>>, %arg2: memref<1x128xf32, #tpu.memory_space<vmem>>, %arg3: memref<1x128xf32, #tpu.memory_space<vmem>>, %arg4: memref<128x128xbf16, #tpu.memory_space<vmem>>, %arg5: memref<8x128xf32, #tpu.memory_space<vmem>>) attributes {dimension_semantics = [#tpu.dimension_semantics<parallel>], iteration_bounds = array<i64: 1>, scalar_prefetch = 0 : i64, scratch_operands = 0 : i64, tpu.core_type = #tpu.core_type<tc>, window_params = [{transform_indices = @transform_0, window_bounds = array<i64: 8, 128>}, {pipeline_mode = #tpu.pipeline_mode<synchronous>, transform_indices = @transform_1, window_bounds = array<i64: 1, 128>}, {pipeline_mode = #tpu.pipeline_mode<synchronous>, transform_indices = @transform_2, window_bounds = array<i64: 1, 128>}, {pipeline_mode = #tpu.pipeline_mode<synchronous>, transform_indices = @transform_3, window_bounds = array<i64: 128, 128>}, {transform_indices = @transform_4, window_bounds = array<i64: 8, 128>}]} {
    %c0 = arith.constant 0 : index
    %c0_0 = arith.constant 0 : index
    %0 = vector.load %arg1[%c0, %c0_0] : memref<8x128xf32, #tpu.memory_space<vmem>>, vector<8x128xf32>
    %c0_1 = arith.constant 0 : index
    %c0_2 = arith.constant 0 : index
    %1 = vector.load %arg4[%c0_1, %c0_2] : memref<128x128xbf16, #tpu.memory_space<vmem>>, vector<128x128xbf16>
    %2 = arith.truncf %0 : vector<8x128xf32> to vector<8x128xbf16>
    %3 = arith.extf %2 : vector<8x128xbf16> to vector<8x128xf32>
    %4 = arith.subf %0, %3 : vector<8x128xf32>
    %5 = arith.truncf %4 : vector<8x128xf32> to vector<8x128xbf16>
    %cst = arith.constant dense<0.000000e+00> : vector<8x128xf32>
    %6 = tpu.matmul %2, %1, %cst {dimension_numbers = #tpu.dot_dimension_numbers<[1], [0], [0], [1], [0, 0, 1, 1], [], []>} : vector<8x128xbf16>, vector<128x128xbf16>, vector<8x128xf32> -> vector<8x128xf32>
    %cst_3 = arith.constant dense<0.000000e+00> : vector<8x128xf32>
    %7 = tpu.matmul %5, %1, %cst_3 {dimension_numbers = #tpu.dot_dimension_numbers<[1], [0], [0], [1], [0, 0, 1, 1], [], []>} : vector<8x128xbf16>, vector<128x128xbf16>, vector<8x128xf32> -> vector<8x128xf32>
    %8 = arith.addf %6, %7 : vector<8x128xf32>
    %cst_4 = arith.constant 3.125000e-02 : f32
    %9 = vector.broadcast %cst_4 : f32 to vector<8x128xf32>
    %10 = arith.mulf %8, %9 : vector<8x128xf32>
    %11 = arith.subf %0, %10 : vector<8x128xf32>
    %12 = arith.mulf %11, %11 : vector<8x128xf32>
    %13 = arith.truncf %12 : vector<8x128xf32> to vector<8x128xbf16>
    %14 = arith.extf %13 : vector<8x128xbf16> to vector<8x128xf32>
    %15 = arith.subf %12, %14 : vector<8x128xf32>
    %16 = arith.truncf %15 : vector<8x128xf32> to vector<8x128xbf16>
    %cst_5 = arith.constant dense<0.000000e+00> : vector<8x128xf32>
    %17 = tpu.matmul %13, %1, %cst_5 {dimension_numbers = #tpu.dot_dimension_numbers<[1], [0], [0], [1], [0, 0, 1, 1], [], []>} : vector<8x128xbf16>, vector<128x128xbf16>, vector<8x128xf32> -> vector<8x128xf32>
    %cst_6 = arith.constant dense<0.000000e+00> : vector<8x128xf32>
    %18 = tpu.matmul %16, %1, %cst_6 {dimension_numbers = #tpu.dot_dimension_numbers<[1], [0], [0], [1], [0, 0, 1, 1], [], []>} : vector<8x128xbf16>, vector<128x128xbf16>, vector<8x128xf32> -> vector<8x128xf32>
    %19 = arith.addf %17, %18 : vector<8x128xf32>
    %cst_7 = arith.constant 3.125000e-02 : f32
    %20 = vector.broadcast %cst_7 : f32 to vector<8x128xf32>
    %21 = arith.mulf %19, %20 : vector<8x128xf32>
    %cst_8 = arith.constant 9.99999974E-6 : f32
    %22 = vector.broadcast %cst_8 : f32 to vector<8x128xf32>
    %23 = arith.addf %21, %22 : vector<8x128xf32>
    %24 = math.rsqrt %23 : vector<8x128xf32>
    %c0_9 = arith.constant 0 : index
    %c0_10 = arith.constant 0 : index
    %25 = vector.load %arg2[%c0_9, %c0_10] : memref<1x128xf32, #tpu.memory_space<vmem>>, vector<1x128xf32>
    %c0_11 = arith.constant 0 : index
    %c0_12 = arith.constant 0 : index
    %26 = vector.load %arg3[%c0_11, %c0_12] : memref<1x128xf32, #tpu.memory_space<vmem>>, vector<1x128xf32>
    %27 = arith.mulf %11, %24 : vector<8x128xf32>
    %28 = vector.broadcast %25 : vector<1x128xf32> to vector<8x128xf32>
    %29 = arith.mulf %27, %28 : vector<8x128xf32>
    %30 = vector.broadcast %26 : vector<1x128xf32> to vector<8x128xf32>
    %31 = arith.addf %29, %30 : vector<8x128xf32>
    %c0_13 = arith.constant 0 : index
    %c0_14 = arith.constant 0 : index
    %32 = vector.load %arg5[%c0_13, %c0_14] : memref<8x128xf32, #tpu.memory_space<vmem>>, vector<8x128xf32>
    tpu.vector_store %arg5[%c0_13, %c0_14], %31 {strides = array<i32>} : memref<8x128xf32, #tpu.memory_space<vmem>>, vector<8x128xf32>,
    return
  }
  func.func @transform_0(%arg0: i32) -> (i32, i32) {
    %c0_i32 = arith.constant 0 : i32
    %c0_i32_0 = arith.constant 0 : i32
    return %arg0, %c0_i32 : i32, i32
  }
  func.func @transform_1(%arg0: i32) -> (i32, i32) {
    %c0_i32 = arith.constant 0 : i32
    %c0_i32_0 = arith.constant 0 : i32
    %c0_i32_1 = arith.constant 0 : i32
    return %c0_i32, %c0_i32_0 : i32, i32
  }
  func.func @transform_2(%arg0: i32) -> (i32, i32) {
    %c0_i32 = arith.constant 0 : i32
    %c0_i32_0 = arith.constant 0 : i32
    %c0_i32_1 = arith.constant 0 : i32
    return %c0_i32, %c0_i32_0 : i32, i32
  }
  func.func @transform_3(%arg0: i32) -> (i32, i32) {
    %c0_i32 = arith.constant 0 : i32
    %c0_i32_0 = arith.constant 0 : i32
    %c0_i32_1 = arith.constant 0 : i32
    return %c0_i32, %c0_i32_0 : i32, i32
  }
  func.func @transform_4(%arg0: i32) -> (i32, i32) {
    %c0_i32 = arith.constant 0 : i32
    %c0_i32_0 = arith.constant 0 : i32
    return %arg0, %c0_i32 : i32, i32
  }
}

</mosaic_0001>

<bundles_post_ra>
// kernel: tpu_custom_call.1
= control target key start
LH: loop header
LB: loop body
LE: loop exit
PB: predicated region body
PF: predicated region fallthrough
CT: control target
= control target key end

     0   :  { %9 = vsyncpa [#allocation3], 0  ;;  %s784_s0 = inlined_call_operand.hbm [shape: f32[8,128], index: 0, kind: input, shape index: {}]   ;;  %s785_s1 = inlined_call_operand.hbm [shape: f32[1,128], index: 1, kind: input, shape index: {}]   ;;  %s786_s2 = inlined_call_operand.hbm [shape: f32[1,128], index: 2, kind: input, shape index: {}]   ;;  %s787_s3 = inlined_call_operand.hbm [shape: bf16[128,128], index: 3, kind: input, shape index: {}]   ;;  %s788_s4 = inlined_call_operand.hbm [shape: f32[8,128], index: 4, kind: output, shape index: {}]  }
   0x1   :  { %10 = vsyncpa [#allocation6], 0 }
   0x2   :  { %11 = vsyncpa [#allocation9], 0 }
   0x3   :  { %12 = vsyncpa [#allocation4], 0  ;;  %s613_s15 = smov [#allocation5]   ;;  %s614_s17 = smov [#allocation2]  }
   0x4   :  { %s29_s16 = sshll.u32 %s613_s15, 4  ;;  %s19_s18 = sshll.u32 %s614_s17, 4  ;;  %s30_s16 = int_to_ptr.vmem [resolvable:$true] %s29_s16  ;;  %s20_s18 = int_to_ptr.vmem [resolvable:$true] %s19_s18 }
   0x5   :  { %s495_s21 = scalar_lea.hbm %s785_s1, 16 }
   0x6   :  { %p496_p0 = scmp.ne.s32.totalorder %s785_s1, %s495_s21  ;;  %p499_p1 = scmp.lt.u32.totalorder %s495_s21, %s785_s1 }
   0x8   :  { %p501_p2 = pnand %p499_p1, %p496_p0 }
   0xa   :  { %504 = shalt.err (!%p501_p2)
}
   0xb   :  { %s505_s26 = scalar_lea.vmem %s30_s16, 16  ;;  %s509_s27 = scalar_lea.vmem %s30_s16, 32 }
   0xc   :  { %p506_p3 = scmp.ne.s32.totalorder %s30_s16, %s505_s26  ;;  %p510_p4 = scmp.lt.s32.totalorder %s30_s16, %s30_s16 }
   0xd   :  { %p511_p5 = scmp.lt.s32.totalorder %s509_s27, %s505_s26 }
   0xf   :  { %p512_p6 = por %p511_p5, %p510_p4 }
  0x11   :  { %p513_p7 = pnand %p512_p6, %p506_p3 }
  0x13   :  { %516 = shalt.err (!%p513_p7)
}
  0x14   :  { %32 = dma.hbm_to_vmem [thread:$0]  %s785_s1, 16, %s30_s16, [#allocation6]  }
  0x15   :  { %s517_s6 = scalar_lea.hbm %s784_s0, 128 }
  0x16   :  { %p518_p8 = scmp.ne.s32.totalorder %s784_s0, %s517_s6  ;;  %p521_p9 = scmp.lt.u32.totalorder %s517_s6, %s784_s0 }
  0x18   :  { %p523_p10 = pnand %p521_p9, %p518_p8 }
  0x1a   :  { %526 = shalt.err (!%p523_p10)
}
  0x1b   :  { %s527_s11 = scalar_lea.vmem %s20_s18, 128  ;;  %p532_p12 = scmp.lt.s32.totalorder %s20_s18, %s20_s18 }
  0x1c   :  { %p528_p11 = scmp.ne.s32.totalorder %s20_s18, %s527_s11  ;;  %p533_p13 = scmp.lt.s32.totalorder %s527_s11, %s527_s11 }
  0x1e   :  { %p534_p0 = por %p533_p13, %p532_p12 }
  0x20   :  { %p535_p1 = pnand %p534_p0, %p528_p11 }
  0x22   :  { %538 = shalt.err (!%p535_p1)
}
  0x23   :  { %22 = dma.hbm_to_vmem [thread:$0]  %s784_s0, 128, %s20_s18, [#allocation3]  }
  0x24   :  { %s615_s13 = smov [#allocation7]   ;;  %s616_s15 = smov [#allocation8]  }
  0x25   :  { %s39_s14 = sshll.u32 %s615_s13, 4  ;;  %s48_s16 = sshll.u32 %s616_s15, 4  ;;  %s40_s14 = int_to_ptr.vmem [resolvable:$true] %s39_s14  ;;  %s671_s16 = int_to_ptr.vmem [resolvable:$true] %s48_s16 }
  0x26   :  { %s539_s20 = scalar_lea.hbm %s786_s2, 16 }
  0x27   :  { %p540_p2 = scmp.ne.s32.totalorder %s786_s2, %s539_s20  ;;  %p543_p3 = scmp.lt.u32.totalorder %s539_s20, %s786_s2 }
  0x29   :  { %p545_p4 = pnand %p543_p3, %p540_p2 }
  0x2b   :  { %548 = shalt.err (!%p545_p4)
}
  0x2c   :  { %s549_s0 = scalar_lea.vmem %s40_s14, 16  ;;  %s553_s18 = scalar_lea.vmem %s40_s14, 32 }
  0x2d   :  { %p550_p5 = scmp.ne.s32.totalorder %s40_s14, %s549_s0  ;;  %p554_p6 = scmp.lt.s32.totalorder %s40_s14, %s40_s14 }
  0x2e   :  { %p555_p7 = scmp.lt.s32.totalorder %s553_s18, %s549_s0 }
  0x30   :  { %p556_p8 = por %p555_p7, %p554_p6 }
  0x32   :  { %p557_p9 = pnand %p556_p8, %p550_p5 }
  0x34   :  { %560 = shalt.err (!%p557_p9)
}
  0x35   :  { %42 = dma.hbm_to_vmem [thread:$0]  %s786_s2, 16, %s40_s14, [#allocation6]  }
  0x36   :  { %s561_s29 = scalar_lea.hbm %s787_s3, 1024 }
  0x37   :  { %p562_p10 = scmp.ne.s32.totalorder %s787_s3, %s561_s29  ;;  %p565_p11 = scmp.lt.u32.totalorder %s561_s29, %s787_s3 }
  0x39   :  { %p567_p12 = pnand %p565_p11, %p562_p10 }
  0x3b   :  { %570 = shalt.err (!%p567_p12)
}
  0x3c   :  { %s571_s8 = scalar_lea.vmem %s671_s16, 1024  ;;  %p576_p0 = scmp.lt.s32.totalorder %s671_s16, %s671_s16 }
  0x3d   :  { %p572_p13 = scmp.ne.s32.totalorder %s671_s16, %s571_s8  ;;  %p577_p1 = scmp.lt.s32.totalorder %s571_s8, %s571_s8 }
  0x3f   :  { %p578_p2 = por %p577_p1, %p576_p0 }
  0x41   :  { %p579_p3 = pnand %p578_p2, %p572_p13 }
  0x43   :  { %582 = shalt.err (!%p579_p3)
}
  0x44   :  { %s617_s2 = smov 64   ;;  %s618_s9 = smov 4  }
  0x45   :  { %54 = dma.hbm_to_vmem [thread:$0]  %s787_s3, 1024, %s671_s16, [#allocation9], %s617_s2, %s617_s2, %s618_s9  }
  0x46   :  { %605 = dma.done.wait [#allocation3], 128  }
  0x47   :  { %606 = vsyncadd [#allocation3], 4294967168 }
  0x48   :  { %607 = dma.done.wait [#allocation6], 32  }
  0x49   :  { %608 = vsyncadd [#allocation6], 4294967264 }
  0x4a   :  { %609 = dma.done.wait [#allocation9], 1024  }
  0x4b   :  { %610 = vsyncadd [#allocation9], 4294966272  ;;  %v619_v0 = vmov 0.0   ;;  %vm620_vm0 = vmmov 0   ;;  %v708_v1 = vld [vmem:[#allocation8] sm:$0xff]   ;;  %v711_v2 = vld [vmem:[#allocation8 + $0x8] sm:$0xff]  }
  0x4c   :  { %388 = vmatprep.subr.bf16.mxu0 %v619_v0  ;;  %404 = vmatprep.mubr.msk.bf16.mxu0 %vm620_vm0, %v619_v0  ;;  %v717_v3 = vld [vmem:[#allocation8 + $0x10] sm:$0xff]   ;;  %v723_v4 = vld [vmem:[#allocation8 + $0x18] sm:$0xff]   ;;  %v729_v5 = vld [vmem:[#allocation8 + $0x20] sm:$0xff]   ;;  %s621_s3 = smov [#allocation10]  }
  0x4d   :  { %428 = vmatprep.subr.bf16.mxu1 %v619_v0  ;;  %444 = vmatprep.mubr.msk.bf16.mxu1 %vm620_vm0, %v619_v0  ;;  %v68_v6 = vld [vmem:[#allocation2] sm:$0xff]  ;;  %v490_v8 = vld [vmem:[#allocation8 + $0x28] sm:$0xff]   ;;  %v350_v32 = vld [vmem:[#allocation5] ss:$0 sm:$0xff]  ;;  %s331_s1 = sshll.u32 %s621_s3, 4  ;;  %s332_s1 = int_to_ptr.vmem [resolvable:$true] %s331_s1 }
  0x4e   :  { %389 = vmatpush3.bf16.msra.mxu0 %v708_v1  ;;  %429 = vmatpush3.bf16.msra.mxu1 %v708_v1  ;;  %v85_v7 = vpack.c.bf16 %v68_v6, %v68_v6  ;;  %v491_v10 = vld [vmem:[#allocation8 + $0x30] sm:$0xff]   ;;  %v492_v12 = vld [vmem:[#allocation8 + $0x38] sm:$0xff]   ;;  %s583_s12 = scalar_lea.vmem %s332_s1, 128  ;;  %p588_p5 = scmp.lt.s32.totalorder %s332_s1, %s332_s1 }
  0x4f   :  { %390 = vmatprep.subr.bf16.mxu0 %v619_v0  ;;  %430 = vmatprep.subr.bf16.mxu1 %v619_v0  ;;  %v351_v34 = vld [vmem:[#allocation7] ss:$0 sm:$0xff]  ;;  %p584_p4 = scmp.ne.s32.totalorder %s332_s1, %s583_s12  ;;  %p589_p6 = scmp.lt.s32.totalorder %s583_s12, %s583_s12 }
  0x50   :  { %v86_v9 = vunpack.c.l.bf16 %v85_v7 }
  0x51   :  { %p590_p7 = por %p589_p6, %p588_p5 }
  0x52   :  { %391 = vmatpush3.bf16.msra.mxu0 %v711_v2  ;;  %431 = vmatpush3.bf16.msra.mxu1 %v711_v2  ;;  %v87_v11 = vsub.f32 %v68_v6, %v86_v9 }
  0x53   :  { %392 = vmatprep.subr.bf16.mxu0 %v619_v0  ;;  %432 = vmatprep.subr.bf16.mxu1 %v619_v0  ;;  %p591_p8 = pnand %p590_p7, %p584_p4 }
  0x54   :  { %v88_v13 = vpack.c.bf16 %v87_v11, %v87_v11 }
  0x56   :  { %393 = vmatpush3.bf16.msra.mxu0 %v717_v3  ;;  %433 = vmatpush3.bf16.msra.mxu1 %v717_v3 }
  0x57   :  { %394 = vmatprep.subr.bf16.mxu0 %v619_v0  ;;  %434 = vmatprep.subr.bf16.mxu1 %v619_v0 }
  0x5a   :  { %395 = vmatpush3.bf16.msra.mxu0 %v723_v4  ;;  %435 = vmatpush3.bf16.msra.mxu1 %v723_v4 }
  0x5b   :  { %396 = vmatprep.subr.bf16.mxu0 %v619_v0  ;;  %436 = vmatprep.subr.bf16.mxu1 %v619_v0 }
  0x5e   :  { %397 = vmatpush3.bf16.msra.mxu0 %v729_v5  ;;  %437 = vmatpush3.bf16.msra.mxu1 %v729_v5 }
  0x5f   :  { %398 = vmatprep.subr.bf16.mxu0 %v619_v0  ;;  %438 = vmatprep.subr.bf16.mxu1 %v619_v0 }
  0x62   :  { %399 = vmatpush3.bf16.msra.mxu0 %v490_v8  ;;  %439 = vmatpush3.bf16.msra.mxu1 %v490_v8 }
  0x63   :  { %400 = vmatprep.subr.bf16.mxu0 %v619_v0  ;;  %440 = vmatprep.subr.bf16.mxu1 %v619_v0 }
  0x66   :  { %401 = vmatpush3.bf16.msra.mxu0 %v491_v10  ;;  %441 = vmatpush3.bf16.msra.mxu1 %v491_v10 }
  0x67   :  { %402 = vmatprep.subr.bf16.mxu0 %v619_v0  ;;  %442 = vmatprep.subr.bf16.mxu1 %v619_v0 }
  0x6a   :  { %403 = vmatpush3.bf16.msra.mxu0 %v492_v12  ;;  %443 = vmatpush3.bf16.msra.mxu1 %v492_v12 }
  0x6b   :  { %408 = vmatprep.subr.bf16.mxu0 %v619_v0  ;;  %448 = vmatprep.subr.bf16.mxu1 %v619_v0 }
  0x6d   :  { %405 = vmatmul.mubr.bf16.vlgmr.msra.gmra.mrb[0].mxu0 %v88_v13 }
  0x6e   :  { %409 = vmatpush3.bf16.msra.mxu0 %v708_v1  ;;  %424 = vmatprep.mubr.msk.bf16.mxu0 %vm620_vm0, %v619_v0 }
  0x6f   :  { %410 = vmatprep.subr.bf16.mxu0 %v619_v0 }
  0x72   :  { %411 = vmatpush3.bf16.msra.mxu0 %v711_v2 }
  0x73   :  { %412 = vmatprep.subr.bf16.mxu0 %v619_v0 }
  0x76   :  { %413 = vmatpush3.bf16.msra.mxu0 %v717_v3 }
  0x77   :  { %414 = vmatprep.subr.bf16.mxu0 %v619_v0 }
  0x7a   :  { %415 = vmatpush3.bf16.msra.mxu0 %v723_v4 }
  0x7b   :  { %416 = vmatprep.subr.bf16.mxu0 %v619_v0 }
  0x7e   :  { %417 = vmatpush3.bf16.msra.mxu0 %v729_v5 }
  0x7f   :  { %418 = vmatprep.subr.bf16.mxu0 %v619_v0 }
  0x82   :  { %419 = vmatpush3.bf16.msra.mxu0 %v490_v8 }
  0x83   :  { %420 = vmatprep.subr.bf16.mxu0 %v619_v0 }
  0x86   :  { %421 = vmatpush3.bf16.msra.mxu0 %v491_v10 }
  0x87   :  { %422 = vmatprep.subr.bf16.mxu0 %v619_v0 }
  0x8a   :  { %423 = vmatpush3.bf16.msra.mxu0 %v492_v12 }
  0x8d   :  { %425 = vmatmul.mubr.bf16.vlgmr.msra.gmra.mrb[0].mxu0 %v85_v7 }
 0x160   :  { %v211_v14 = vpop.f32.mrb[0].mxu0 }
 0x161   :  { %v217_v15 = vmul.f32 0.03125, %v211_v14  ;;  %v426_v16 = vpop.f32.mrb[1].mxu0 }
 0x162   :  { %v214_v17 = vpop.f32.mrb[2].mxu0 }
 0x163   :  { %v218_v18 = vsub.f32 %v68_v6, %v217_v15  ;;  %v427_v19 = vpop.f32.mrb[3].mxu0 }
 0x165   :  { %v219_v20 = vmul.f32 %v218_v18, %v218_v18 }
 0x167   :  { %v220_v21 = vpack.c.bf16 %v219_v20, %v219_v20 }
 0x169   :  { %v221_v22 = vunpack.c.l.bf16 %v220_v21 }
 0x16b   :  { %v222_v23 = vsub.f32 %v219_v20, %v221_v22 }
 0x16d   :  { %v223_v24 = vpack.c.bf16 %v222_v23, %v222_v23 }
 0x16f   :  { %445 = vmatmul.mubr.bf16.vlgmr.msra.gmra.mrb[0].mxu1 %v223_v24 }
 0x170   :  { %449 = vmatpush3.bf16.msra.mxu1 %v708_v1  ;;  %464 = vmatprep.mubr.msk.bf16.mxu1 %vm620_vm0, %v619_v0 }
 0x171   :  { %450 = vmatprep.subr.bf16.mxu1 %v619_v0 }
 0x174   :  { %451 = vmatpush3.bf16.msra.mxu1 %v711_v2 }
 0x175   :  { %452 = vmatprep.subr.bf16.mxu1 %v619_v0 }
 0x178   :  { %453 = vmatpush3.bf16.msra.mxu1 %v717_v3 }
 0x179   :  { %454 = vmatprep.subr.bf16.mxu1 %v619_v0 }
 0x17c   :  { %455 = vmatpush3.bf16.msra.mxu1 %v723_v4 }
 0x17d   :  { %456 = vmatprep.subr.bf16.mxu1 %v619_v0 }
 0x180   :  { %457 = vmatpush3.bf16.msra.mxu1 %v729_v5 }
 0x181   :  { %458 = vmatprep.subr.bf16.mxu1 %v619_v0 }
 0x184   :  { %459 = vmatpush3.bf16.msra.mxu1 %v490_v8 }
 0x185   :  { %460 = vmatprep.subr.bf16.mxu1 %v619_v0 }
 0x188   :  { %461 = vmatpush3.bf16.msra.mxu1 %v491_v10 }
 0x189   :  { %462 = vmatprep.subr.bf16.mxu1 %v619_v0 }
 0x18c   :  { %463 = vmatpush3.bf16.msra.mxu1 %v492_v12 }
 0x18f   :  { %465 = vmatmul.mubr.bf16.vlgmr.msra.gmra.mrb[0].mxu1 %v220_v21 }
 0x262   :  { %v298_v25 = vpop.f32.mrb[0].mxu1 }
 0x263   :  { %v304_v26 = vmul.f32 0.03125, %v298_v25  ;;  %v466_v27 = vpop.f32.mrb[1].mxu1 }
 0x264   :  { %v301_v28 = vpop.f32.mrb[2].mxu1 }
 0x265   :  { %v305_v29 = vadd.f32 1e-05, %v304_v26  ;;  %v467_v30 = vpop.f32.mrb[3].mxu1 }
 0x267   :  { %493 = vrsqrt.f32 %v305_v29 }
 0x271   :  { %v494_v31 = vpop.eup %493 }
 0x272   :  { %v309_v33 = vmul.f32 %v494_v31, %v218_v18 }
 0x274   :  { %v316_v35 = vmul.f32 %v350_v32, %v309_v33 }
 0x276   :  { %v323_v36 = vadd.f32 %v351_v34, %v316_v35 }
 0x278   :  { %324 = vst [vmem:[#allocation10] sm:$0xff] %v323_v36 }
 0x279   :  { %594 = shalt.err (!%p591_p8)
}
 0x27a   :  { %s595_s15 = scalar_lea.hbm %s788_s4, 128 }
 0x27b   :  { %p596_p9 = scmp.ne.s32.totalorder %s788_s4, %s595_s15  ;;  %p599_p10 = scmp.lt.u32.totalorder %s595_s15, %s788_s4 }
 0x27d   :  { %p601_p11 = pnand %p599_p10, %p596_p9 }
 0x27f   :  { %604 = shalt.err (!%p601_p11)
}
 0x280   :  { %334 = dma.vmem_to_hbm [thread:$0]  %s332_s1, 128, %s788_s4, [#allocation4]  }
 0x281   :  { %611 = dma.done.wait [#allocation4], 128  }
 0x282   :  { %612 = vsyncadd [#allocation4], 4294967168 }
 0x283   :  { %338 = vsyncpa [#allocation3], 1 }
 0x284   :  { %339 = vsyncpa [#allocation6], 1 }
 0x285   :  { %340 = vsyncpa [#allocation9], 1 }
 0x286   :  { %341 = vsyncpa [#allocation4], 1 }

</bundles_post_ra>
